<compile_context>
chip_gen: v5e
topology: v5e:2x2
jax: 0.10.0
libtpu: 0.0.40
codegen_flags: <defaults>
</compile_context>

<pallas_src>
import functools
import math

import jax
import jax.numpy as jnp
from jax.experimental import pallas as pl
from jax.experimental.pallas import tpu as pltpu

LANE = 128
_VMEM_LIMIT = 48 * 1024 * 1024


def _round_up(v, m):
    return (v + m - 1) // m * m


# --------------------------------------------------------------------------
# Projection kernel: y = h @ W_l ;  z = h @ W_r + b   (tiled over node rows)
# --------------------------------------------------------------------------
def _proj_kernel(h_ref, wl_ref, wr_ref, b_ref, y_ref, z_ref):
    h = h_ref[...]
    y_ref[...] = jnp.dot(h, wl_ref[...], preferred_element_type=jnp.float32)
    z_ref[...] = (
        jnp.dot(h, wr_ref[...], preferred_element_type=jnp.float32) + b_ref[...]
    )


def sage_project(h, w_l, w_r, b, *, tile_m):
    n, c_in = h.shape
    c_out = w_l.shape[1]
    grid = (n // tile_m,)
    return pl.pallas_call(
        _proj_kernel,
        out_shape=(
            jax.ShapeDtypeStruct((n, c_out), jnp.float32),
            jax.ShapeDtypeStruct((n, c_out), jnp.float32),
        ),
        grid_spec=pltpu.PrefetchScalarGridSpec(
            num_scalar_prefetch=0,
            grid=grid,
            in_specs=[
                pl.BlockSpec((tile_m, c_in), lambda i: (i, 0)),      # h row tile
                pl.BlockSpec((c_in, c_out), lambda i: (0, 0)),       # W_l (resident)
                pl.BlockSpec((c_in, c_out), lambda i: (0, 0)),       # W_r (resident)
                pl.BlockSpec((1, c_out), lambda i: (0, 0)),          # bias
            ],
            out_specs=(
                pl.BlockSpec((tile_m, c_out), lambda i: (i, 0)),
                pl.BlockSpec((tile_m, c_out), lambda i: (i, 0)),
            ),
        ),
        compiler_params=pltpu.CompilerParams(
            dimension_semantics=("parallel",),
            vmem_limit_bytes=_VMEM_LIMIT,
        ),
    )(h, w_l, w_r, b)


# --------------------------------------------------------------------------
# Aggregation kernel: out = adj @ y + z, contraction over N blocked on axis 1
# --------------------------------------------------------------------------
def _agg_kernel(adj_ref, y_ref, z_ref, out_ref, acc_ref, *, apply_relu):
    k = pl.program_id(1)

    @pl.when(k == 0)
    def _():
        acc_ref[...] = jnp.zeros_like(acc_ref)

    acc_ref[...] += jnp.dot(
        adj_ref[...], y_ref[...], preferred_element_type=jnp.float32
    )

    @pl.when(k == pl.num_programs(1) - 1)
    def _():
        out = acc_ref[...] + z_ref[...]
        if apply_relu:
            out = jnp.maximum(out, 0.0)
        out_ref[...] = out.astype(out_ref.dtype)


def sage_aggregate(adj, y, z, *, apply_relu, tile_m, tile_k):
    n = adj.shape[0]
    c_out = y.shape[1]
    grid = (n // tile_m, n // tile_k)
    kernel = functools.partial(_agg_kernel, apply_relu=apply_relu)
    return pl.pallas_call(
        kernel,
        out_shape=jax.ShapeDtypeStruct((n, c_out), jnp.float32),
        grid_spec=pltpu.PrefetchScalarGridSpec(
            num_scalar_prefetch=0,
            grid=grid,
            in_specs=[
                pl.BlockSpec((tile_m, tile_k), lambda i, k: (i, k)),  # adj block
                pl.BlockSpec((tile_k, c_out), lambda i, k: (k, 0)),   # y block
                pl.BlockSpec((tile_m, c_out), lambda i, k: (i, 0)),   # z row tile
            ],
            out_specs=pl.BlockSpec((tile_m, c_out), lambda i, k: (i, 0)),
            scratch_shapes=[pltpu.VMEM((tile_m, c_out), jnp.float32)],
        ),
        compiler_params=pltpu.CompilerParams(
            dimension_semantics=("parallel", "arbitrary"),
            vmem_limit_bytes=_VMEM_LIMIT,
        ),
    )(adj, y, z)


# --------------------------------------------------------------------------
# Full SAGE forward
# --------------------------------------------------------------------------
def sage_forward(x, adj, params, *, dropout=0.0, tile_m=256, tile_k=512):
    """SAGE.forward: all but last layer get ReLU (+ dropout, identity in eval)."""
    n, c_in = x.shape
    out_channels = params[-1][0].shape[1]

    # Clamp tiles to graph size and pad nodes so both tiles divide N.
    n_min = _round_up(n, LANE)
    tile_m = min(tile_m, n_min)
    tile_k = min(tile_k, n_min)
    n_pad = _round_up(n, math.lcm(tile_m, tile_k))

    c_in_pad = _round_up(c_in, LANE)
    adj_p = jnp.pad(adj.astype(jnp.float32), ((0, n_pad - n), (0, n_pad - n)))
    h = jnp.pad(x.astype(jnp.float32), ((0, n_pad - n), (0, c_in_pad - c_in)))

    num_layers = len(params)
    for li, (w_l, w_r, b) in enumerate(params):
        ci, co = w_l.shape
        ci_pad, co_pad = _round_up(ci, LANE), _round_up(co, LANE)
        wl_p = jnp.pad(w_l, ((0, ci_pad - ci), (0, co_pad - co)))
        wr_p = jnp.pad(w_r, ((0, ci_pad - ci), (0, co_pad - co)))
        b_p = jnp.pad(b.reshape(1, -1), ((0, 0), (0, co_pad - co)))

        y, z = sage_project(h, wl_p, wr_p, b_p, tile_m=tile_m)
        last = li == num_layers - 1
        h = sage_aggregate(
            adj_p, y, z, apply_relu=not last, tile_m=tile_m, tile_k=tile_k
        )
        # TODO(synk): F.dropout omitted (eval-mode semantics -> identity).

    return h[:n, :out_channels]


def init_sage_params(key, in_channels, hidden_channels, out_channels, num_layers):
    dims = [in_channels] + [hidden_channels] * (num_layers - 1) + [out_channels]
    params = []
    for li in range(num_layers):
        c_in, c_out = dims[li], dims[li + 1]
        key, k1, k2 = jax.random.split(key, 3)
        scale = 1.0 / jnp.sqrt(jnp.float32(c_in))
        w_l = jax.random.uniform(k1, (c_in, c_out), jnp.float32, -scale, scale)
        w_r = jax.random.uniform(k2, (c_in, c_out), jnp.float32, -scale, scale)
        b = jnp.zeros((1, c_out), jnp.float32)
        params.append((w_l, w_r, b))
    return params


if __name__ == "__main__":
    key = jax.random.PRNGKey(0)

    # Small synthetic graph / model sizes.
    N = 128           # number of nodes
    IN_C = 32         # in_channels
    HID_C = 64        # hidden_channels
    OUT_C = 32        # out_channels
    NUM_LAYERS = 3
    DROPOUT = 0.5     # unused at inference

    key, kx, ka, kp = jax.random.split(key, 4)
    x = jax.random.normal(kx, (N, IN_C), jnp.float32)

    # Random sparse-ish adjacency, row-normalized (mean aggregation, no self-loops).
    a = (jax.random.uniform(ka, (N, N)) < 0.05).astype(jnp.float32)
    a = a * (1.0 - jnp.eye(N, dtype=jnp.float32))
    deg = a.sum(axis=1, keepdims=True)
    adj = a / jnp.maximum(deg, 1.0)  # zero-degree rows aggregate to 0, as in PyG mean aggr

    params = init_sage_params(kp, IN_C, HID_C, OUT_C, NUM_LAYERS)

    out = sage_forward(x, adj, params, dropout=DROPOUT)
    out = jax.block_until_ready(out)

    # Pure-JAX reference check.
    h = x
    for li, (w_l, w_r, b) in enumerate(params):
        h = adj @ h @ w_l + h @ w_r + b
        if li != NUM_LAYERS - 1:
            h = jnp.maximum(h, 0.0)
    assert out.shape == (N, OUT_C)
    assert jnp.allclose(out, h, atol=1e-4, rtol=1e-4)

    print("KERNEL_OK")
</pallas_src>

<mosaic_0001>
module attributes {stable_mosaic.version = 11 : i64} {
  func.func @_proj_kernel(%arg0: i32, %arg1: memref<128x128xf32, #tpu.memory_space<vmem>>, %arg2: memref<128x128xf32, #tpu.memory_space<vmem>>, %arg3: memref<128x128xf32, #tpu.memory_space<vmem>>, %arg4: memref<1x128xf32, #tpu.memory_space<vmem>>, %arg5: memref<128x128xf32, #tpu.memory_space<vmem>>, %arg6: memref<128x128xf32, #tpu.memory_space<vmem>>) attributes {dimension_semantics = [#tpu.dimension_semantics<parallel>], iteration_bounds = array<i64: 1>, scalar_prefetch = 0 : i64, scratch_operands = 0 : i64, tpu.core_type = #tpu.core_type<tc>, window_params = [{transform_indices = @transform_0, window_bounds = array<i64: 128, 128>}, {pipeline_mode = #tpu.pipeline_mode<synchronous>, transform_indices = @transform_1, window_bounds = array<i64: 128, 128>}, {pipeline_mode = #tpu.pipeline_mode<synchronous>, transform_indices = @transform_2, window_bounds = array<i64: 128, 128>}, {pipeline_mode = #tpu.pipeline_mode<synchronous>, transform_indices = @transform_3, window_bounds = array<i64: 1, 128>}, {transform_indices = @transform_4, window_bounds = array<i64: 128, 128>}, {transform_indices = @transform_5, window_bounds = array<i64: 128, 128>}]} {
    %c0 = arith.constant 0 : index
    %c0_0 = arith.constant 0 : index
    %0 = vector.load %arg1[%c0, %c0_0] : memref<128x128xf32, #tpu.memory_space<vmem>>, vector<128x128xf32>
    %c0_1 = arith.constant 0 : index
    %c0_2 = arith.constant 0 : index
    %1 = vector.load %arg2[%c0_1, %c0_2] : memref<128x128xf32, #tpu.memory_space<vmem>>, vector<128x128xf32>
    %cst = arith.constant dense<0.000000e+00> : vector<128x128xf32>
    %2 = tpu.matmul %0, %1, %cst {dimension_numbers = #tpu.dot_dimension_numbers<[1], [0], [0], [1], [0, 0, 1, 1], [], []>} : vector<128x128xf32>, vector<128x128xf32>, vector<128x128xf32> -> vector<128x128xf32>
    %c0_3 = arith.constant 0 : index
    %c0_4 = arith.constant 0 : index
    %3 = vector.load %arg5[%c0_3, %c0_4] : memref<128x128xf32, #tpu.memory_space<vmem>>, vector<128x128xf32>
    tpu.vector_store %arg5[%c0_3, %c0_4], %2 {strides = array<i32>} : memref<128x128xf32, #tpu.memory_space<vmem>>, vector<128x128xf32>,
    %c0_5 = arith.constant 0 : index
    %c0_6 = arith.constant 0 : index
    %4 = vector.load %arg3[%c0_5, %c0_6] : memref<128x128xf32, #tpu.memory_space<vmem>>, vector<128x128xf32>
    %cst_7 = arith.constant dense<0.000000e+00> : vector<128x128xf32>
    %5 = tpu.matmul %0, %4, %cst_7 {dimension_numbers = #tpu.dot_dimension_numbers<[1], [0], [0], [1], [0, 0, 1, 1], [], []>} : vector<128x128xf32>, vector<128x128xf32>, vector<128x128xf32> -> vector<128x128xf32>
    %c0_8 = arith.constant 0 : index
    %c0_9 = arith.constant 0 : index
    %6 = vector.load %arg4[%c0_8, %c0_9] : memref<1x128xf32, #tpu.memory_space<vmem>>, vector<1x128xf32>
    %7 = vector.broadcast %6 : vector<1x128xf32> to vector<128x128xf32>
    %8 = arith.addf %5, %7 : vector<128x128xf32>
    %c0_10 = arith.constant 0 : index
    %c0_11 = arith.constant 0 : index
    %9 = vector.load %arg6[%c0_10, %c0_11] : memref<128x128xf32, #tpu.memory_space<vmem>>, vector<128x128xf32>
    tpu.vector_store %arg6[%c0_10, %c0_11], %8 {strides = array<i32>} : memref<128x128xf32, #tpu.memory_space<vmem>>, vector<128x128xf32>,
    return
  }
  func.func @transform_0(%arg0: i32) -> (i32, i32) {
    %c0_i32 = arith.constant 0 : i32
    %c0_i32_0 = arith.constant 0 : i32
    return %arg0, %c0_i32 : i32, i32
  }
  func.func @transform_1(%arg0: i32) -> (i32, i32) {
    %c0_i32 = arith.constant 0 : i32
    %c0_i32_0 = arith.constant 0 : i32
    %c0_i32_1 = arith.constant 0 : i32
    return %c0_i32, %c0_i32_0 : i32, i32
  }
  func.func @transform_2(%arg0: i32) -> (i32, i32) {
    %c0_i32 = arith.constant 0 : i32
    %c0_i32_0 = arith.constant 0 : i32
    %c0_i32_1 = arith.constant 0 : i32
    return %c0_i32, %c0_i32_0 : i32, i32
  }
  func.func @transform_3(%arg0: i32) -> (i32, i32) {
    %c0_i32 = arith.constant 0 : i32
    %c0_i32_0 = arith.constant 0 : i32
    %c0_i32_1 = arith.constant 0 : i32
    return %c0_i32, %c0_i32_0 : i32, i32
  }
  func.func @transform_4(%arg0: i32) -> (i32, i32) {
    %c0_i32 = arith.constant 0 : i32
    %c0_i32_0 = arith.constant 0 : i32
    return %arg0, %c0_i32 : i32, i32
  }
  func.func @transform_5(%arg0: i32) -> (i32, i32) {
    %c0_i32 = arith.constant 0 : i32
    %c0_i32_0 = arith.constant 0 : i32
    return %arg0, %c0_i32 : i32, i32
  }
}

</mosaic_0001>

<bundles_post_ra>
// kernel: tpu_custom_call.1
= control target key start
LH: loop header
LB: loop body
LE: loop exit
PB: predicated region body
PF: predicated region fallthrough
CT: control target
= control target key end

     0   :  { %11 = vsyncpa [#allocation3], 0  ;;  %s576_s0 = inlined_call_operand.hbm [shape: f32[128,128], index: 0, kind: input, shape index: {}]   ;;  %s577_s1 = inlined_call_operand.hbm [shape: f32[128,128], index: 1, kind: input, shape index: {}]   ;;  %s578_s2 = inlined_call_operand.hbm [shape: f32[128,128], index: 2, kind: input, shape index: {}]   ;;  %s579_s3 = inlined_call_operand.vmem [shape: f32[1,128], index: 3, kind: input, shape index: {}]   ;;  %s580_s4 = inlined_call_operand.hbm [shape: f32[128,128], index: 4, kind: output, shape index: {0}]   ;;  %s581_s5 = inlined_call_operand.hbm [shape: f32[128,128], index: 5, kind: output, shape index: {1}]  }
   0x1   :  { %12 = vsyncpa [#allocation6], 0 }
   0x2   :  { %13 = vsyncpa [#allocation4], 0 }
   0x3   :  { %14 = vsyncpa [#allocation10], 0  ;;  %s32_s20 = sshll.u32 %s577_s1, 4  ;;  %s488_s21 = smov [#allocation5]   ;;  %s33_s20 = int_to_ptr.hbm [resolvable:$true] %s32_s20 }
   0x4   :  { %s34_s22 = sshll.u32 %s488_s21, 4  ;;  %s19_s25 = sshll.u32 %s576_s0, 4  ;;  %s35_s22 = int_to_ptr.vmem [resolvable:$true] %s34_s22  ;;  %s20_s25 = int_to_ptr.hbm [resolvable:$true] %s19_s25 }
   0x5   :  { %s489_s26 = smov 128   ;;  %s490_s27 = smov 8  }
   0x6   :  { %40 = dma.hbm_to_vmem [thread:$0]  %s33_s20, 2048, %s35_s22, [#allocation6], %s489_s26, %s489_s26, %s490_s27  }
   0x7   :  { %s491_s28 = smov [#allocation2]   ;;  %s45_s1 = sshll.u32 %s578_s2, 4  ;;  %s46_s1 = int_to_ptr.hbm [resolvable:$true] %s45_s1 }
   0x8   :  { %s21_s29 = sshll.u32 %s491_s28, 4  ;;  %s492_s0 = smov [#allocation7]   ;;  %s22_s29 = int_to_ptr.vmem [resolvable:$true] %s21_s29 }
   0x9   :  { %27 = dma.hbm_to_vmem [thread:$0]  %s20_s25, 2048, %s22_s29, [#allocation3], %s489_s26, %s489_s26, %s490_s27  }
   0xa   :  { %s47_s7 = sshll.u32 %s492_s0, 4  ;;  %s48_s7 = int_to_ptr.vmem [resolvable:$true] %s47_s7 }
   0xb   :  { %53 = dma.hbm_to_vmem [thread:$0]  %s46_s1, 2048, %s48_s7, [#allocation6], %s489_s26, %s489_s26, %s490_s27  }
   0xc   :  { %480 = dma.done.wait [#allocation3], 2048  }
   0xd   :  { %481 = vsyncadd [#allocation3], 4294965248 }
   0xe   :  { %482 = dma.done.wait [#allocation6], 4096  }
   0xf   :  { %483 = vsyncadd [#allocation6], 4294963200  ;;  %v196_v0 = vld [vmem:[#allocation7 + $0x78] sm:$0xff]  ;;  %v195_v2 = vld [vmem:[#allocation7 + $0x70] sm:$0xff]  ;;  %s288_s12 = sshll.u32 %s580_s4, 4  ;;  %s494_s13 = smov [#allocation9]   ;;  %s289_s12 = int_to_ptr.hbm [resolvable:$true] %s288_s12 }
  0x10   :  { %v99_v1 = vld [vmem:[#allocation5 + $0x78] sm:$0xff]  ;;  %336 = vmatpush.msra.mxu3 %v196_v0  ;;  %v98_v3 = vld [vmem:[#allocation5 + $0x70] sm:$0xff]  ;;  %v194_v4 = vld [vmem:[#allocation7 + $0x68] sm:$0xff]  ;;  %201 = vmatpush.msra.mxu1 %v196_v0  ;;  %s299_s14 = sshll.u32 %s494_s13, 4  ;;  %s301_s17 = sshll.u32 %s581_s5, 4  ;;  %s300_s14 = int_to_ptr.vmem [resolvable:$true] %s299_s14  ;;  %s302_s17 = int_to_ptr.hbm [resolvable:$true] %s301_s17 }
  0x11   :  { %320 = vmatpush.msra.mxu2 %v99_v1  ;;  %v97_v5 = vld [vmem:[#allocation5 + $0x68] sm:$0xff]  ;;  %100 = vmatpush.msra.mxu0 %v99_v1  ;;  %v193_v6 = vld [vmem:[#allocation7 + $0x60] sm:$0xff]  ;;  %v192_v8 = vld [vmem:[#allocation7 + $0x58] sm:$0xff] }
  0x12   :  { %337 = vmatpush.msra.mxu3 %v195_v2  ;;  %v96_v7 = vld [vmem:[#allocation5 + $0x60] sm:$0xff]  ;;  %202 = vmatpush.msra.mxu1 %v195_v2  ;;  %v95_v9 = vld [vmem:[#allocation5 + $0x58] sm:$0xff]  ;;  %v191_v10 = vld [vmem:[#allocation7 + $0x50] sm:$0xff] }
  0x13   :  { %321 = vmatpush.msra.mxu2 %v98_v3  ;;  %101 = vmatpush.msra.mxu0 %v98_v3  ;;  %v94_v11 = vld [vmem:[#allocation5 + $0x50] sm:$0xff]  ;;  %v190_v12 = vld [vmem:[#allocation7 + $0x48] sm:$0xff]  ;;  %v189_v14 = vld [vmem:[#allocation7 + $0x40] sm:$0xff] }
  0x14   :  { %338 = vmatpush.msra.mxu3 %v194_v4  ;;  %203 = vmatpush.msra.mxu1 %v194_v4  ;;  %v93_v13 = vld [vmem:[#allocation5 + $0x48] sm:$0xff]  ;;  %v92_v15 = vld [vmem:[#allocation5 + $0x40] sm:$0xff]  ;;  %v188_v16 = vld [vmem:[#allocation7 + $0x38] sm:$0xff] }
  0x15   :  { %322 = vmatpush.msra.mxu2 %v97_v5  ;;  %102 = vmatpush.msra.mxu0 %v97_v5  ;;  %v91_v17 = vld [vmem:[#allocation5 + $0x38] sm:$0xff]  ;;  %v187_v18 = vld [vmem:[#allocation7 + $0x30] sm:$0xff]  ;;  %v186_v20 = vld [vmem:[#allocation7 + $0x28] sm:$0xff] }
  0x16   :  { %339 = vmatpush.msra.mxu3 %v193_v6  ;;  %204 = vmatpush.msra.mxu1 %v193_v6  ;;  %v90_v19 = vld [vmem:[#allocation5 + $0x30] sm:$0xff]  ;;  %v89_v21 = vld [vmem:[#allocation5 + $0x28] sm:$0xff]  ;;  %v185_v22 = vld [vmem:[#allocation7 + $0x20] sm:$0xff] }
  0x17   :  { %323 = vmatpush.msra.mxu2 %v96_v7  ;;  %103 = vmatpush.msra.mxu0 %v96_v7  ;;  %v88_v23 = vld [vmem:[#allocation5 + $0x20] sm:$0xff]  ;;  %v184_v24 = vld [vmem:[#allocation7 + $0x18] sm:$0xff]  ;;  %v183_v26 = vld [vmem:[#allocation7 + $0x10] sm:$0xff] }
  0x18   :  { %340 = vmatpush.msra.mxu3 %v192_v8  ;;  %205 = vmatpush.msra.mxu1 %v192_v8  ;;  %v87_v25 = vld [vmem:[#allocation5 + $0x18] sm:$0xff]  ;;  %v86_v27 = vld [vmem:[#allocation5 + $0x10] sm:$0xff]  ;;  %v182_v28 = vld [vmem:[#allocation7 + $0x8] sm:$0xff] }
  0x19   :  { %324 = vmatpush.msra.mxu2 %v95_v9  ;;  %104 = vmatpush.msra.mxu0 %v95_v9  ;;  %v85_v29 = vld [vmem:[#allocation5 + $0x8] sm:$0xff]  ;;  %v181_v30 = vld [vmem:[#allocation7] sm:$0xff]  ;;  %v78_v36 = vld [vmem:[#allocation2 + $0x50] sm:$0xff] }
  0x1a   :  { %341 = vmatpush.msra.mxu3 %v191_v10  ;;  %206 = vmatpush.msra.mxu1 %v191_v10  ;;  %v84_v31 = vld [vmem:[#allocation5] sm:$0xff]  ;;  %v77_v34 = vld [vmem:[#allocation2 + $0x48] sm:$0xff]  ;;  %v70_v37 = vld [vmem:[#allocation2 + $0x10] sm:$0xff] }
  0x1b   :  { %325 = vmatpush.msra.mxu2 %v94_v11  ;;  %105 = vmatpush.msra.mxu0 %v94_v11  ;;  %v76_v32 = vld [vmem:[#allocation2 + $0x40] sm:$0xff]  ;;  %v69_v35 = vld [vmem:[#allocation2 + $0x8] sm:$0xff]  ;;  %v79_v38 = vld [vmem:[#allocation2 + $0x58] sm:$0xff] }
  0x1c   :  { %342 = vmatpush.msra.mxu3 %v190_v12  ;;  %207 = vmatpush.msra.mxu1 %v190_v12  ;;  %v68_v33 = vld [vmem:[#allocation2] sm:$0xff]  ;;  %v71_v39 = vld [vmem:[#allocation2 + $0x18] sm:$0xff]  ;;  %v81_v42 = vld [vmem:[#allocation2 + $0x68] sm:$0xff] }
  0x1d   :  { %326 = vmatpush.msra.mxu2 %v93_v13  ;;  %106 = vmatpush.msra.mxu0 %v93_v13  ;;  %v80_v40 = vld [vmem:[#allocation2 + $0x60] sm:$0xff]  ;;  %v73_v43 = vld [vmem:[#allocation2 + $0x28] sm:$0xff]  ;;  %v82_v44 = vld [vmem:[#allocation2 + $0x70] sm:$0xff] }
  0x1e   :  { %343 = vmatpush.msra.mxu3 %v189_v14  ;;  %208 = vmatpush.msra.mxu1 %v189_v14  ;;  %v72_v41 = vld [vmem:[#allocation2 + $0x20] sm:$0xff]  ;;  %v74_v45 = vld [vmem:[#allocation2 + $0x30] sm:$0xff]  ;;  %v83_v46 = vld [vmem:[#allocation2 + $0x78] sm:$0xff] }
  0x1f   :  { %327 = vmatpush.msra.mxu2 %v92_v15  ;;  %107 = vmatpush.msra.mxu0 %v92_v15  ;;  %v75_v47 = vld [vmem:[#allocation2 + $0x38] sm:$0xff]  ;;  %v546_v48 = vld [vmem:[%s579_s3] ss:$0 sm:$0xff]  ;;  %s493_s3 = smov [#allocation8]  }
  0x20   :  { %344 = vmatpush.msra.mxu3 %v188_v16  ;;  %209 = vmatpush.msra.mxu1 %v188_v16  ;;  %s286_s9 = sshll.u32 %s493_s3, 4  ;;  %s287_s9 = int_to_ptr.vmem [resolvable:$true] %s286_s9 }
  0x21   :  { %328 = vmatpush.msra.mxu2 %v91_v17  ;;  %108 = vmatpush.msra.mxu0 %v91_v17 }
  0x22   :  { %345 = vmatpush.msra.mxu3 %v187_v18  ;;  %210 = vmatpush.msra.mxu1 %v187_v18 }
  0x23   :  { %329 = vmatpush.msra.mxu2 %v90_v19  ;;  %109 = vmatpush.msra.mxu0 %v90_v19 }
  0x24   :  { %346 = vmatpush.msra.mxu3 %v186_v20  ;;  %211 = vmatpush.msra.mxu1 %v186_v20 }
  0x25   :  { %330 = vmatpush.msra.mxu2 %v89_v21  ;;  %110 = vmatpush.msra.mxu0 %v89_v21 }
  0x26   :  { %347 = vmatpush.msra.mxu3 %v185_v22  ;;  %212 = vmatpush.msra.mxu1 %v185_v22 }
  0x27   :  { %331 = vmatpush.msra.mxu2 %v88_v23  ;;  %111 = vmatpush.msra.mxu0 %v88_v23 }
  0x28   :  { %348 = vmatpush.msra.mxu3 %v184_v24  ;;  %213 = vmatpush.msra.mxu1 %v184_v24 }
  0x29   :  { %332 = vmatpush.msra.mxu2 %v87_v25  ;;  %112 = vmatpush.msra.mxu0 %v87_v25 }
  0x2a   :  { %349 = vmatpush.msra.mxu3 %v183_v26  ;;  %214 = vmatpush.msra.mxu1 %v183_v26 }
  0x2b   :  { %333 = vmatpush.msra.mxu2 %v86_v27  ;;  %113 = vmatpush.msra.mxu0 %v86_v27 }
  0x2c   :  { %350 = vmatpush.msra.mxu3 %v182_v28  ;;  %215 = vmatpush.msra.mxu1 %v182_v28 }
  0x2d   :  { %334 = vmatpush.msra.mxu2 %v85_v29  ;;  %114 = vmatpush.msra.mxu0 %v85_v29 }
  0x2e   :  { %351 = vmatpush.msra.mxu3 %v181_v30  ;;  %216 = vmatpush.msra.mxu1 %v181_v30 }
  0x2f   :  { %335 = vmatpush.msra.mxu2 %v84_v31  ;;  %241 = vmatmul.f32.vlgmr.msra.gmra.mxu3 %v76_v32 }
  0x30   :  { %140 = vmatmul.f32.vlgmr.msra.gmra.mxu2 %v76_v32  ;;  %115 = vmatpush.msra.mxu0 %v84_v31 }
  0x31   :  { %217 = vmatmul.f32.vlgmr.msra.gmra.mxu1 %v68_v33  ;;  %116 = vmatmul.f32.vlgmr.msra.gmra.mxu0 %v68_v33 }
  0x37   :  { %244 = vmatmul.f32.gmra.mxu3 %v77_v34 }
  0x38   :  { %143 = vmatmul.f32.gmra.mxu2 %v77_v34 }
  0x39   :  { %220 = vmatmul.f32.gmra.mxu1 %v69_v35  ;;  %119 = vmatmul.f32.gmra.mxu0 %v69_v35 }
  0x3f   :  { %247 = vmatmul.f32.gmra.mxu3 %v78_v36 }
  0x40   :  { %146 = vmatmul.f32.gmra.mxu2 %v78_v36 }
  0x41   :  { %223 = vmatmul.f32.gmra.mxu1 %v70_v37  ;;  %122 = vmatmul.f32.gmra.mxu0 %v70_v37 }
  0x47   :  { %250 = vmatmul.f32.gmra.mxu3 %v79_v38 }
  0x48   :  { %149 = vmatmul.f32.gmra.mxu2 %v79_v38 }
  0x49   :  { %226 = vmatmul.f32.gmra.mxu1 %v71_v39  ;;  %125 = vmatmul.f32.gmra.mxu0 %v71_v39 }
  0x4f   :  { %253 = vmatmul.f32.gmra.mxu3 %v80_v40 }
  0x50   :  { %152 = vmatmul.f32.gmra.mxu2 %v80_v40 }
  0x51   :  { %229 = vmatmul.f32.gmra.mxu1 %v72_v41  ;;  %128 = vmatmul.f32.gmra.mxu0 %v72_v41 }
  0x57   :  { %256 = vmatmul.f32.gmra.mxu3 %v81_v42 }
  0x58   :  { %155 = vmatmul.f32.gmra.mxu2 %v81_v42 }
  0x59   :  { %232 = vmatmul.f32.gmra.mxu1 %v73_v43  ;;  %131 = vmatmul.f32.gmra.mxu0 %v73_v43 }
  0x5f   :  { %259 = vmatmul.f32.gmra.mxu3 %v82_v44 }
  0x60   :  { %158 = vmatmul.f32.gmra.mxu2 %v82_v44 }
  0x61   :  { %235 = vmatmul.f32.gmra.mxu1 %v74_v45  ;;  %134 = vmatmul.f32.gmra.mxu0 %v74_v45 }
  0x67   :  { %262 = vmatmul.f32.gmra.mxu3 %v83_v46 }
  0x68   :  { %161 = vmatmul.f32.gmra.mxu2 %v83_v46 }
  0x69   :  { %238 = vmatmul.f32.gmra.mxu1 %v75_v47  ;;  %137 = vmatmul.f32.gmra.mxu0 %v75_v47 }
  0xae   :  { %v218_v49 = vpop.f32.mrf.mxu1  ;;  %v117_v50 = vpop.f32.mrf.mxu0 }
  0xaf   :  { %v219_v51 = vadd.f32 %v546_v48, %v218_v49  ;;  %165 = vst [vmem:[#allocation8] sm:$0xff] %v117_v50 }
  0xb1   :  { %266 = vst [vmem:[#allocation9] sm:$0xff] %v219_v51 }
  0xb2   :  { %v242_v52 = vpop.f32.mrf.mxu3 }
  0xb3   :  { %v141_v53 = vpop.f32.mrf.mxu2  ;;  %v243_v54 = vadd.f32 %v546_v48, %v242_v52 }
  0xb4   :  { %173 = vst [vmem:[#allocation8 + $0x40] sm:$0xff] %v141_v53 }
  0xb5   :  { %274 = vst [vmem:[#allocation9 + $0x40] sm:$0xff] %v243_v54 }
  0xb6   :  { %v221_v55 = vpop.f32.mrf.mxu1  ;;  %v120_v56 = vpop.f32.mrf.mxu0 }
  0xb7   :  { %v222_v57 = vadd.f32 %v546_v48, %v221_v55  ;;  %166 = vst [vmem:[#allocation8 + $0x8] sm:$0xff] %v120_v56 }
  0xb9   :  { %267 = vst [vmem:[#allocation9 + $0x8] sm:$0xff] %v222_v57 }
  0xba   :  { %v245_v58 = vpop.f32.mrf.mxu3 }
  0xbb   :  { %v144_v59 = vpop.f32.mrf.mxu2  ;;  %v246_v60 = vadd.f32 %v546_v48, %v245_v58 }
  0xbc   :  { %174 = vst [vmem:[#allocation8 + $0x48] sm:$0xff] %v144_v59 }
  0xbd   :  { %275 = vst [vmem:[#allocation9 + $0x48] sm:$0xff] %v246_v60 }
  0xbe   :  { %v224_v61 = vpop.f32.mrf.mxu1  ;;  %v123_v62 = vpop.f32.mrf.mxu0 }
  0xbf   :  { %v225_v63 = vadd.f32 %v546_v48, %v224_v61  ;;  %167 = vst [vmem:[#allocation8 + $0x10] sm:$0xff] %v123_v62 }
  0xc1   :  { %268 = vst [vmem:[#allocation9 + $0x10] sm:$0xff] %v225_v63 }
  0xc2   :  { %v248_v0 = vpop.f32.mrf.mxu3 }
  0xc3   :  { %v147_v1 = vpop.f32.mrf.mxu2  ;;  %v249_v2 = vadd.f32 %v546_v48, %v248_v0 }
  0xc4   :  { %175 = vst [vmem:[#allocation8 + $0x50] sm:$0xff] %v147_v1 }
  0xc5   :  { %276 = vst [vmem:[#allocation9 + $0x50] sm:$0xff] %v249_v2 }
  0xc6   :  { %v227_v3 = vpop.f32.mrf.mxu1  ;;  %v126_v4 = vpop.f32.mrf.mxu0 }
  0xc7   :  { %v228_v5 = vadd.f32 %v546_v48, %v227_v3  ;;  %168 = vst [vmem:[#allocation8 + $0x18] sm:$0xff] %v126_v4 }
  0xc9   :  { %269 = vst [vmem:[#allocation9 + $0x18] sm:$0xff] %v228_v5 }
  0xca   :  { %v251_v6 = vpop.f32.mrf.mxu3 }
  0xcb   :  { %v150_v7 = vpop.f32.mrf.mxu2  ;;  %v252_v8 = vadd.f32 %v546_v48, %v251_v6 }
  0xcc   :  { %176 = vst [vmem:[#allocation8 + $0x58] sm:$0xff] %v150_v7 }
  0xcd   :  { %277 = vst [vmem:[#allocation9 + $0x58] sm:$0xff] %v252_v8 }
  0xce   :  { %v230_v9 = vpop.f32.mrf.mxu1  ;;  %v129_v10 = vpop.f32.mrf.mxu0 }
  0xcf   :  { %v231_v11 = vadd.f32 %v546_v48, %v230_v9  ;;  %169 = vst [vmem:[#allocation8 + $0x20] sm:$0xff] %v129_v10 }
  0xd1   :  { %270 = vst [vmem:[#allocation9 + $0x20] sm:$0xff] %v231_v11 }
  0xd2   :  { %v254_v12 = vpop.f32.mrf.mxu3 }
  0xd3   :  { %v153_v13 = vpop.f32.mrf.mxu2  ;;  %v255_v14 = vadd.f32 %v546_v48, %v254_v12 }
  0xd4   :  { %177 = vst [vmem:[#allocation8 + $0x60] sm:$0xff] %v153_v13 }
  0xd5   :  { %278 = vst [vmem:[#allocation9 + $0x60] sm:$0xff] %v255_v14 }
  0xd6   :  { %v233_v15 = vpop.f32.mrf.mxu1  ;;  %v132_v16 = vpop.f32.mrf.mxu0 }
  0xd7   :  { %v234_v17 = vadd.f32 %v546_v48, %v233_v15  ;;  %170 = vst [vmem:[#allocation8 + $0x28] sm:$0xff] %v132_v16 }
  0xd9   :  { %271 = vst [vmem:[#allocation9 + $0x28] sm:$0xff] %v234_v17 }
  0xda   :  { %v257_v18 = vpop.f32.mrf.mxu3 }
  0xdb   :  { %v156_v19 = vpop.f32.mrf.mxu2  ;;  %v258_v20 = vadd.f32 %v546_v48, %v257_v18 }
  0xdc   :  { %178 = vst [vmem:[#allocation8 + $0x68] sm:$0xff] %v156_v19 }
  0xdd   :  { %279 = vst [vmem:[#allocation9 + $0x68] sm:$0xff] %v258_v20 }
  0xde   :  { %v236_v21 = vpop.f32.mrf.mxu1  ;;  %v135_v22 = vpop.f32.mrf.mxu0 }
  0xdf   :  { %v237_v23 = vadd.f32 %v546_v48, %v236_v21  ;;  %171 = vst [vmem:[#allocation8 + $0x30] sm:$0xff] %v135_v22 }
  0xe1   :  { %272 = vst [vmem:[#allocation9 + $0x30] sm:$0xff] %v237_v23 }
  0xe2   :  { %v260_v24 = vpop.f32.mrf.mxu3 }
  0xe3   :  { %v159_v25 = vpop.f32.mrf.mxu2  ;;  %v261_v26 = vadd.f32 %v546_v48, %v260_v24 }
  0xe4   :  { %179 = vst [vmem:[#allocation8 + $0x70] sm:$0xff] %v159_v25 }
  0xe5   :  { %280 = vst [vmem:[#allocation9 + $0x70] sm:$0xff] %v261_v26 }
  0xe6   :  { %v239_v27 = vpop.f32.mrf.mxu1  ;;  %v138_v28 = vpop.f32.mrf.mxu0 }
  0xe7   :  { %v240_v29 = vadd.f32 %v546_v48, %v239_v27  ;;  %172 = vst [vmem:[#allocation8 + $0x38] sm:$0xff] %v138_v28 }
  0xe9   :  { %273 = vst [vmem:[#allocation9 + $0x38] sm:$0xff] %v240_v29 }
  0xea   :  { %v263_v30 = vpop.f32.mrf.mxu3 }
  0xeb   :  { %v162_v31 = vpop.f32.mrf.mxu2  ;;  %v264_v32 = vadd.f32 %v546_v48, %v263_v30 }
  0xec   :  { %180 = vst [vmem:[#allocation8 + $0x78] sm:$0xff] %v162_v31 }
  0xed   :  { %294 = dma.vmem_to_hbm [thread:$0]  %s287_s9, 2048, %s289_s12, [#allocation4], %s489_s26, %s489_s26, %s490_s27   ;;  %281 = vst [vmem:[#allocation9 + $0x78] sm:$0xff] %v264_v32 }
  0xee   :  { %307 = dma.vmem_to_hbm [thread:$0]  %s300_s14, 2048, %s302_s17, [#allocation10], %s489_s26, %s489_s26, %s490_s27  }
  0xef   :  { %484 = dma.done.wait [#allocation4], 2048  }
  0xf0   :  { %485 = vsyncadd [#allocation4], 4294965248 }
  0xf1   :  { %486 = dma.done.wait [#allocation10], 2048  }
  0xf2   :  { %487 = vsyncadd [#allocation10], 4294965248 }
  0xf3   :  { %316 = vsyncpa [#allocation3], 1 }
  0xf4   :  { %317 = vsyncpa [#allocation6], 1 }
  0xf5   :  { %318 = vsyncpa [#allocation4], 1 }
  0xf6   :  { %319 = vsyncpa [#allocation10], 1 }

</bundles_post_ra>
